<compile_context>
chip_gen: v7x
topology: tpu7x:2x2x1
jax: 0.10.0
libtpu: 0.0.40
codegen_flags: <defaults>
</compile_context>

<pallas_src>
import jax
import jax.numpy as jnp
from jax.experimental import pallas as pl
from jax.experimental.pallas import tpu as pltpu


def _time_aware_gate_kernel(dt_ref, h_ref, wb_ref, o_ref):
    # dt: (TB, 1), h: (TB, H), wb: (2, H) [row0 = w, row1 = fused bias] -> o: (TB, H)
    dt = dt_ref[...].astype(jnp.float32)          # (TB, 1)
    wb = wb_ref[...].astype(jnp.float32)          # (2, H)
    w = wb[0:1, :]                                # (1, H)
    b = wb[1:2, :]                                # (1, H)

    # Linear(1, H): delta_t @ W^T + bias == dt * w + bias (broadcast over batch).
    z = dt * w + b
    # relu as max-with-immediate; exp goes to the EUP (free slot here).
    gamma = jnp.exp(-jnp.maximum(z, 0.0))         # in (0, 1], no overflow possible

    h = h_ref[...]
    # Do the final multiply in h's dtype (bf16 VALU on v6e/v7x halves VPU /
    # store-side traffic; identical math for f32 inputs).
    o_ref[...] = (gamma.astype(h.dtype) * h).astype(o_ref.dtype)


def _round_up(x, m):
    return (x + m - 1) // m * m


def _cdiv(a, b):
    return (a + b - 1) // b


@jax.jit
def time_aware_gate(delta_t, h_t, w, b_lin, b_gamma):
    """delta_t: (B, 1) or (B,), h_t: (B, H), w/b_lin/b_gamma: (H,)-like -> (B, H)."""
    B, H = h_t.shape
    itemsize = jnp.dtype(h_t.dtype).itemsize

    delta_t = jnp.reshape(delta_t, (B, 1))
    # Fuse Linear weight + (Linear bias + b_gamma) into one tiny resident (2, H)
    # block (small arrays only — no padding / copies of the big tensors).
    w_row = jnp.reshape(w, (1, H)).astype(jnp.float32)
    bias_row = (jnp.reshape(b_lin, (1, H)) + jnp.reshape(b_gamma, (1, H))).astype(jnp.float32)
    wb = jnp.concatenate([w_row, bias_row], axis=0)  # (2, H)

    # ---- Batch tile (TB) sizing: bytes-driven, VMEM-budgeted ----------------
    TARGET_BLOCK_BYTES = 2 << 20   # ~2 MiB per (TB, H) block -> ~85% of HBM BW
    VMEM_BUDGET_BYTES = 16 << 20   # double-buffered working set; safe on all gens

    row_bytes = max(1, H * itemsize)
    # Per batch row in the working set: 2x h (in) + 2x out + 2x dt (lane-padded to 128).
    per_row_ws = 4 * row_bytes + 2 * 128 * itemsize

    tb_target = max(8, TARGET_BLOCK_BYTES // row_bytes)
    tb_vmem = max(8, VMEM_BUDGET_BYTES // per_row_ws)
    TB = int(min(tb_target, tb_vmem))
    TB = max(8, (TB // 8) * 8)

    B8 = _round_up(B, 8)
    TB = min(TB, B8)

    # Balance tiles so the last grid step isn't nearly empty.
    num_tiles = _cdiv(B, TB)
    TB = min(TB, _round_up(_cdiv(B, num_tiles), 8))
    # v7x megacore: make sure both TensorCores get a tile when batch allows it.
    if _cdiv(B, TB) < 2 and B8 >= 16:
        TB = _round_up(_cdiv(B, 2), 8)
    num_tiles = _cdiv(B, TB)

    # Note: block last dim == H (the full array dim), so no hidden-dim padding is
    # needed; if H % 128 != 0 the final lane group uses masked stores instead of
    # an extra HBM pad/copy pass.
    out = pl.pallas_call(
        _time_aware_gate_kernel,
        out_shape=jax.ShapeDtypeStruct((B, H), h_t.dtype),
        grid=(num_tiles,),
        in_specs=[
            pl.BlockSpec((TB, 1), lambda i: (i, 0)),    # delta_t, streamed
            pl.BlockSpec((TB, H), lambda i: (i, 0)),    # h_t, streamed
            pl.BlockSpec((2, H), lambda i: (0, 0)),     # fused w/bias, resident
        ],
        out_specs=pl.BlockSpec((TB, H), lambda i: (i, 0)),
        compiler_params=pltpu.CompilerParams(
            dimension_semantics=("parallel",),          # shard tiles across v7x TCs
            vmem_limit_bytes=32 << 20,                  # explicit; >= working set on all gens
        ),
    )(delta_t, h_t, wb)

    return out


if __name__ == "__main__":
    B, H = 8, 32
    key = jax.random.PRNGKey(0)
    k_dt, k_h, k_w, k_b = jax.random.split(key, 4)

    # Inputs (delta_t nonnegative time gaps, h_t arbitrary hidden state).
    delta_t = jax.random.uniform(k_dt, (B, 1), jnp.float32, 0.0, 5.0)
    h_t = jax.random.normal(k_h, (B, H), jnp.float32)

    # Deterministic parameter init mirroring nn.Linear(1, H):
    #   weight, bias ~ U(-1/sqrt(in_features), 1/sqrt(in_features)) = U(-1, 1)
    #   b_gamma = zeros(H)
    w = jax.random.uniform(k_w, (H,), jnp.float32, -1.0, 1.0)
    b_lin = jax.random.uniform(k_b, (H,), jnp.float32, -1.0, 1.0)
    b_gamma = jnp.zeros((H,), jnp.float32)

    out = time_aware_gate(delta_t, h_t, w, b_lin, b_gamma)
    out = jax.block_until_ready(out)

    # Pure-JAX reference check.
    ref = jnp.exp(
        -jnp.maximum(delta_t * w[None, :] + b_lin[None, :] + b_gamma[None, :], 0.0)
    ) * h_t
    assert out.shape == (B, H)
    assert jnp.allclose(out, ref, atol=1e-5, rtol=1e-5)

    print("KERNEL_OK")
</pallas_src>

<mosaic_0001>
module attributes {stable_mosaic.version = 11 : i64} {
  func.func @_time_aware_gate_kernel(%arg0: i32, %arg1: memref<8x1xf32, #tpu.memory_space<vmem>>, %arg2: memref<8x32xf32, #tpu.memory_space<vmem>>, %arg3: memref<2x32xf32, #tpu.memory_space<vmem>>, %arg4: memref<8x32xf32, #tpu.memory_space<vmem>>) attributes {dimension_semantics = [#tpu.dimension_semantics<parallel>], iteration_bounds = array<i64: 1>, scalar_prefetch = 0 : i64, scratch_operands = 0 : i64, tpu.core_type = #tpu.core_type<tc>, window_params = [{transform_indices = @transform_0, window_bounds = array<i64: 8, 1>}, {transform_indices = @transform_1, window_bounds = array<i64: 8, 32>}, {pipeline_mode = #tpu.pipeline_mode<synchronous>, transform_indices = @transform_2, window_bounds = array<i64: 2, 32>}, {transform_indices = @transform_3, window_bounds = array<i64: 8, 32>}]} {
    %c0 = arith.constant 0 : index
    %c0_0 = arith.constant 0 : index
    %0 = vector.load %arg1[%c0, %c0_0] : memref<8x1xf32, #tpu.memory_space<vmem>>, vector<8x1xf32>
    %c0_1 = arith.constant 0 : index
    %c0_2 = arith.constant 0 : index
    %1 = vector.load %arg3[%c0_1, %c0_2] : memref<2x32xf32, #tpu.memory_space<vmem>>, vector<2x32xf32>
    %2 = vector.extract_strided_slice %1 {offsets = [0, 0], sizes = [1, 32], strides = [1, 1]} : vector<2x32xf32> to vector<1x32xf32>
    %3 = vector.extract_strided_slice %1 {offsets = [1, 0], sizes = [1, 32], strides = [1, 1]} : vector<2x32xf32> to vector<1x32xf32>
    %4 = vector.broadcast %0 : vector<8x1xf32> to vector<8x32xf32>
    %5 = vector.broadcast %2 : vector<1x32xf32> to vector<8x32xf32>
    %6 = arith.mulf %4, %5 : vector<8x32xf32>
    %7 = vector.broadcast %3 : vector<1x32xf32> to vector<8x32xf32>
    %8 = arith.addf %6, %7 : vector<8x32xf32>
    %cst = arith.constant 0.000000e+00 : f32
    %9 = vector.broadcast %cst : f32 to vector<8x32xf32>
    %10 = arith.maximumf %8, %9 : vector<8x32xf32>
    %cst_3 = arith.constant 0.000000e+00 : f32
    %11 = vector.broadcast %cst_3 : f32 to vector<8x32xf32>
    %12 = arith.subf %11, %10 : vector<8x32xf32>
    %13 = math.exp %12 : vector<8x32xf32>
    %c0_4 = arith.constant 0 : index
    %c0_5 = arith.constant 0 : index
    %14 = vector.load %arg2[%c0_4, %c0_5] : memref<8x32xf32, #tpu.memory_space<vmem>>, vector<8x32xf32>
    %15 = arith.mulf %13, %14 : vector<8x32xf32>
    %c0_6 = arith.constant 0 : index
    %c0_7 = arith.constant 0 : index
    %16 = vector.load %arg4[%c0_6, %c0_7] : memref<8x32xf32, #tpu.memory_space<vmem>>, vector<8x32xf32>
    tpu.vector_store %arg4[%c0_6, %c0_7], %15 {strides = array<i32>} : memref<8x32xf32, #tpu.memory_space<vmem>>, vector<8x32xf32>,
    return
  }
  func.func @transform_0(%arg0: i32) -> (i32, i32) {
    %c0_i32 = arith.constant 0 : i32
    %c0_i32_0 = arith.constant 0 : i32
    return %arg0, %c0_i32 : i32, i32
  }
  func.func @transform_1(%arg0: i32) -> (i32, i32) {
    %c0_i32 = arith.constant 0 : i32
    %c0_i32_0 = arith.constant 0 : i32
    return %arg0, %c0_i32 : i32, i32
  }
  func.func @transform_2(%arg0: i32) -> (i32, i32) {
    %c0_i32 = arith.constant 0 : i32
    %c0_i32_0 = arith.constant 0 : i32
    %c0_i32_1 = arith.constant 0 : i32
    return %c0_i32, %c0_i32_0 : i32, i32
  }
  func.func @transform_3(%arg0: i32) -> (i32, i32) {
    %c0_i32 = arith.constant 0 : i32
    %c0_i32_0 = arith.constant 0 : i32
    return %arg0, %c0_i32 : i32, i32
  }
}

</mosaic_0001>

<bundles_post_ra>
// kernel: time_aware_gate.1
= control target key start
LH: loop header
LB: loop body
LE: loop exit
PB: predicated region body
PF: predicated region fallthrough
CT: control target
= control target key end

     0   :  { %s126_s0 = inlined_call_operand.vmem [shape: f32[8,1], index: 0, kind: input, shape index: {}]   ;;  %s127_s1 = inlined_call_operand.vmem [shape: f32[8,32], index: 1, kind: input, shape index: {}]   ;;  %s128_s2 = inlined_call_operand.vmem [shape: f32[2,32], index: 2, kind: input, shape index: {}]   ;;  %s129_s3 = inlined_call_operand.hbm [shape: f32[8,32], index: 3, kind: output, shape index: {}]  }
   0x1   :  { %v15_v0 = vld [vmem:[%s126_s0] sm:$0xff] }
   0x2   :  { %8 = vsyncpa [#allocation3], 0  ;;  %v83_v1 = vmov 0   ;;  %v22_v2 = vlaneseq  ;;  %v16_v5 = vld [vmem:[%s128_s2] sm:$0x3]  ;;  %s84_s17 = smov [#allocation2]  }
   0x3   :  { %56 = vset.pattern.permute.xlu0 %v83_v1  ;;  %v36_v15 = vld [vmem:[%s127_s1] sm:$0xff]  ;;  %s46_s18 = sshll.u32 %s84_s17, 4  ;;  %vm38_vm0 = vcmask 261120   ;;  %s47_s18 = int_to_ptr.vmem [resolvable:$true] %s46_s18 }
   0x4   :  { %19 = vperm.xlu0 %56, %v15_v0   ;;  %v23_v3 = vshrl.u32 %v22_v2, 7  ;;  %s59_s2 = scalar_lea.vmem %s47_s18, 128  ;;  %p64_p1 = scmp.lt.s32.totalorder %s47_s18, %s47_s18 }
   0x5   :  { %p60_p0 = scmp.ne.s32.totalorder %s47_s18, %s59_s2  ;;  %p65_p2 = scmp.lt.s32.totalorder %s59_s2, %s59_s2 }
   0x6   :  { %v24_v4 = vsub.s32 0, %v23_v3  ;;  %v29_v6 = vsub.s32 1, %v23_v3 }
   0x7   :  { %p66_p3 = por %p65_p2, %p64_p1 }
   0x8   :  { %v25_v7 = vrot.slane %v16_v5, %v24_v4  ;;  %v30_v8 = vrot.slane %v16_v5, %v29_v6 }
   0x9   :  { %p67_p4 = pnand %p66_p3, %p60_p0 }
  0x83   :  { %v20_v9 = vpop.permute.xlu0 %19 }
  0x84   :  { %v26_v10 = vmul.f32 %v25_v7, %v20_v9 }
  0x86   :  { %v31_v11 = vadd.f32 %v30_v8, %v26_v10 }
  0x88   :  { %v32_v12 = vmax.f32 %v31_v11, 0.0 }
  0x8a   :  { %v33_v13 = vsub.f32 0.0, %v32_v12 }
  0x8c   :  { %v34_v14 = vmul.f32 1.442695, %v33_v13 }
  0x8e   :  { %57 = vpow2.f32 %v34_v14 }
  0x98   :  { %v58_v16 = vpop.eup %57 }
  0x99   :  { %v37_v17 = vmul.f32 %v58_v16, %v36_v15 }
  0x9b   :  { %39 = vst.msk [vmem:[#allocation2] sm:$0xff] %vm38_vm0, %v37_v17 }
  0x9c   :  { %70 = shalt.err (!%p67_p4)
}
  0x9d   :  { %s71_s21 = scalar_lea.hbm %s129_s3, 128 }
  0x9e   :  { %p72_p5 = scmp.ne.s32.totalorder %s129_s3, %s71_s21  ;;  %p75_p6 = scmp.lt.u32.totalorder %s71_s21, %s129_s3 }
  0xa0   :  { %p77_p7 = pnand %p75_p6, %p72_p5 }
  0xa2   :  { %80 = shalt.err (!%p77_p7)
}
  0xa3   :  { %49 = dma.vmem_to_hbm [thread:$0]  %s47_s18, 128, %s129_s3, [#allocation3]  }
  0xa4   :  { %81 = dma.done.wait [#allocation3], 128  }
  0xa5   :  { %82 = vsyncadd [#allocation3], 4294967168 }
  0xa6   :  { %53 = vsyncpa [#allocation3], 1 }

</bundles_post_ra>
